<compile_context>
chip_gen: v7x
topology: tpu7x:2x2x1
jax: 0.10.0
libtpu: 0.0.40
codegen_flags: <defaults>
</compile_context>

<pallas_src>
import functools
import math

import jax
import jax.numpy as jnp
from jax.experimental import pallas as pl
from jax.experimental.pallas import tpu as pltpu


PARAM_ORDER = ["wqkv", "bqkv", "wo", "bo", "g1", "be1",
               "w1", "b1", "w2", "b2", "g2", "be2"]


def encoder_kernel(x_ref,
                   wqkv_ref, bqkv_ref, wo_ref, bo_ref, g1_ref, be1_ref,
                   w1_ref, b1_ref, w2_ref, b2_ref, g2_ref, be2_ref,
                   out_ref, *, num_heads):
    B, S, E = x_ref.shape
    H = num_heads
    D = E // H
    scale = 1.0 / math.sqrt(D)

    x3 = x_ref[...]                               # (B, S, E)
    x2 = x3.reshape(B * S, E)                     # fold batch into the MXU M dim

    # ---- fused QKV projection: ONE (B*S, E) x (E, 3E) matmul + ONE bias add ----
    qkv2 = (jnp.dot(x2, wqkv_ref[...], preferred_element_type=jnp.float32)
            + bqkv_ref[...])                      # (B*S, 3E)
    qkv3 = qkv2.reshape(B, S, 3 * E)

    wo = wo_ref[...]                              # (E, E), loaded once

    # ---- attention: per head, accumulate the output projection ----
    # attn_out = bo + sum_h ctx_h @ wo[h*D:(h+1)*D, :]   (lane-dense accumulator,
    # no concat scratch, no masked width-D stores).  H is small & static -> the
    # Python loop is fully unrolled and visible to the LLO scheduler.
    attn_out = jnp.broadcast_to(bo_ref[...], (B * S, E))
    for h in range(H):
        lo = h * D
        qh = qkv3[:, :, lo:lo + D] * scale        # scale folded into q
        kh = qkv3[:, :, E + lo:E + lo + D]
        vh = qkv3[:, :, 2 * E + lo:2 * E + lo + D]
        # contract over D directly (no k transpose / vxpose)
        s = jnp.einsum('bqd,bkd->bqk', qh, kh,
                       preferred_element_type=jnp.float32)        # (B, S, S)
        s = s - jnp.max(s, axis=-1, keepdims=True)
        p = jnp.exp(s)
        denom = jnp.sum(p, axis=-1, keepdims=True)
        p = p * pl.reciprocal(denom, approx=False)                # EUP; exact f32
        ctx = jnp.einsum('bqk,bkd->bqd', p, vh,
                         preferred_element_type=jnp.float32)      # (B, S, D)
        attn_out = attn_out + jnp.dot(ctx.reshape(B * S, D), wo[lo:lo + D, :],
                                      preferred_element_type=jnp.float32)

    # ---- add & norm 1 ----
    y1 = x2 + attn_out
    mu1 = jnp.mean(y1, axis=-1, keepdims=True)
    var1 = jnp.mean((y1 - mu1) ** 2, axis=-1, keepdims=True)
    n1 = (y1 - mu1) * jax.lax.rsqrt(var1 + 1e-5) * g1_ref[...] + be1_ref[...]

    # ---- feed-forward: Linear -> ReLU -> Linear ----
    hdn = jnp.maximum(
        jnp.dot(n1, w1_ref[...], preferred_element_type=jnp.float32) + b1_ref[...],
        0.0)
    ff = jnp.dot(hdn, w2_ref[...], preferred_element_type=jnp.float32) + b2_ref[...]

    # ---- add & norm 2 ----
    y2 = n1 + ff
    mu2 = jnp.mean(y2, axis=-1, keepdims=True)
    var2 = jnp.mean((y2 - mu2) ** 2, axis=-1, keepdims=True)
    o2 = (y2 - mu2) * jax.lax.rsqrt(var2 + 1e-5) * g2_ref[...] + be2_ref[...]

    out_ref[...] = o2.reshape(B, S, E)


def encoder_forward(x, params, num_heads):
    B, S, E = x.shape
    args = [x] + [params[name] for name in PARAM_ORDER]
    # Single invocation, everything VMEM-resident (total footprint << VMEM).
    in_specs = [pl.BlockSpec(memory_space=pltpu.MemorySpace.VMEM) for _ in args]
    out_spec = pl.BlockSpec(memory_space=pltpu.MemorySpace.VMEM)
    return pl.pallas_call(
        functools.partial(encoder_kernel, num_heads=num_heads),
        out_shape=jax.ShapeDtypeStruct((B, S, E), jnp.float32),
        in_specs=in_specs,
        out_specs=out_spec,
    )(*args)


def encoder_reference(x, params, num_heads):
    """Pure-JAX reference mirroring the PyTorch Encoder.forward semantics.

    The fused (E, 3E) QKV weight stores per-head nn.Linear(E, D) weights stacked
    column-wise: columns [h*D:(h+1)*D], [E + h*D:...], [2E + h*D:...] are head
    h's query / key / value projections respectively.
    """
    B, S, E = x.shape
    H = num_heads
    D = E // H
    scale = 1.0 / math.sqrt(D)

    wqkv, bqkv = params["wqkv"], params["bqkv"]
    q = x @ wqkv[:, 0 * E:1 * E] + bqkv[:, 0 * E:1 * E]
    k = x @ wqkv[:, 1 * E:2 * E] + bqkv[:, 1 * E:2 * E]
    v = x @ wqkv[:, 2 * E:3 * E] + bqkv[:, 2 * E:3 * E]

    heads = []
    for h in range(H):
        qh = q[..., h * D:(h + 1) * D]
        kh = k[..., h * D:(h + 1) * D]
        vh = v[..., h * D:(h + 1) * D]
        s = jnp.einsum("bqd,bkd->bqk", qh, kh) * scale
        a = jax.nn.softmax(s, axis=-1)
        heads.append(jnp.einsum("bqk,bkd->bqd", a, vh))
    concat = jnp.concatenate(heads, axis=-1)
    attn_out = concat @ params["wo"] + params["bo"]

    def layernorm(y, g, b):
        mu = jnp.mean(y, axis=-1, keepdims=True)
        var = jnp.mean((y - mu) ** 2, axis=-1, keepdims=True)
        return (y - mu) * jax.lax.rsqrt(var + 1e-5) * g + b

    n1 = layernorm(x + attn_out, params["g1"], params["be1"])
    ff = jnp.maximum(n1 @ params["w1"] + params["b1"], 0.0) @ params["w2"] + params["b2"]
    return layernorm(n1 + ff, params["g2"], params["be2"])


def init_params(key, embed_dim):
    E = embed_dim
    ks = jax.random.split(key, 12)
    f32 = jnp.float32

    def w(k, shape, s=0.05):
        return (jax.random.normal(k, shape, dtype=f32) * s).astype(f32)

    # Fused QKV weight: columns [0:E]=Q, [E:2E]=K, [2E:3E]=V; within each, the
    # per-head nn.Linear(E, D) weights occupy columns [h*D:(h+1)*D].
    return {
        "wqkv": w(ks[0], (E, 3 * E)), "bqkv": w(ks[1], (1, 3 * E), 0.01),
        "wo": w(ks[2], (E, E)), "bo": w(ks[3], (1, E), 0.01),
        "g1": 1.0 + w(ks[4], (1, E), 0.02), "be1": w(ks[5], (1, E), 0.02),
        "w1": w(ks[6], (E, E)), "b1": w(ks[7], (1, E), 0.01),
        "w2": w(ks[8], (E, E)), "b2": w(ks[9], (1, E), 0.01),
        "g2": 1.0 + w(ks[10], (1, E), 0.02), "be2": w(ks[11], (1, E), 0.02),
    }


if __name__ == "__main__":
    B, S, E, H = 2, 8, 32, 4   # batch, seq_len, embed_dim, num_heads (head_dim = 8)

    key = jax.random.PRNGKey(0)
    kx, kp = jax.random.split(key)
    x = jax.random.normal(kx, (B, S, E), dtype=jnp.float32)
    params = init_params(kp, E)

    out = encoder_forward(x, params, H)
    out = jax.block_until_ready(out)

    ref = encoder_reference(x, params, H)
    assert out.shape == (B, S, E)
    assert jnp.allclose(out, ref, atol=1e-4, rtol=1e-4), "mismatch vs JAX reference"

    print("KERNEL_OK")
</pallas_src>

<mosaic_0001>
module attributes {stable_mosaic.version = 11 : i64} {
  func.func @encoder_kernel(%arg0: memref<2x8x32xf32, #tpu.memory_space<vmem>>, %arg1: memref<32x96xf32, #tpu.memory_space<vmem>>, %arg2: memref<1x96xf32, #tpu.memory_space<vmem>>, %arg3: memref<32x32xf32, #tpu.memory_space<vmem>>, %arg4: memref<1x32xf32, #tpu.memory_space<vmem>>, %arg5: memref<1x32xf32, #tpu.memory_space<vmem>>, %arg6: memref<1x32xf32, #tpu.memory_space<vmem>>, %arg7: memref<32x32xf32, #tpu.memory_space<vmem>>, %arg8: memref<1x32xf32, #tpu.memory_space<vmem>>, %arg9: memref<32x32xf32, #tpu.memory_space<vmem>>, %arg10: memref<1x32xf32, #tpu.memory_space<vmem>>, %arg11: memref<1x32xf32, #tpu.memory_space<vmem>>, %arg12: memref<1x32xf32, #tpu.memory_space<vmem>>, %arg13: memref<2x8x32xf32, #tpu.memory_space<vmem>>) attributes {dimension_semantics = [], scalar_prefetch = 0 : i64, scratch_operands = 0 : i64, tpu.core_type = #tpu.core_type<tc>} {
    %c0 = arith.constant 0 : index
    %c0_0 = arith.constant 0 : index
    %c0_1 = arith.constant 0 : index
    %0 = vector.load %arg0[%c0, %c0_0, %c0_1] : memref<2x8x32xf32, #tpu.memory_space<vmem>>, vector<2x8x32xf32>
    %1 = vector.shape_cast %0 : vector<2x8x32xf32> to vector<16x32xf32>
    %c0_2 = arith.constant 0 : index
    %c0_3 = arith.constant 0 : index
    %2 = vector.load %arg1[%c0_2, %c0_3] : memref<32x96xf32, #tpu.memory_space<vmem>>, vector<32x96xf32>
    %cst = arith.constant dense<0.000000e+00> : vector<16x96xf32>
    %3 = tpu.matmul %1, %2, %cst {dimension_numbers = #tpu.dot_dimension_numbers<[1], [0], [0], [1], [0, 0, 1, 1], [], []>} : vector<16x32xf32>, vector<32x96xf32>, vector<16x96xf32> -> vector<16x96xf32>
    %c0_4 = arith.constant 0 : index
    %c0_5 = arith.constant 0 : index
    %4 = vector.load %arg2[%c0_4, %c0_5] : memref<1x96xf32, #tpu.memory_space<vmem>>, vector<1x96xf32>
    %5 = vector.broadcast %4 : vector<1x96xf32> to vector<16x96xf32>
    %6 = arith.addf %3, %5 : vector<16x96xf32>
    %7 = vector.shape_cast %6 : vector<16x96xf32> to vector<2x8x96xf32>
    %c0_6 = arith.constant 0 : index
    %c0_7 = arith.constant 0 : index
    %8 = vector.load %arg3[%c0_6, %c0_7] : memref<32x32xf32, #tpu.memory_space<vmem>>, vector<32x32xf32>
    %c0_8 = arith.constant 0 : index
    %c0_9 = arith.constant 0 : index
    %9 = vector.load %arg4[%c0_8, %c0_9] : memref<1x32xf32, #tpu.memory_space<vmem>>, vector<1x32xf32>
    %10 = vector.shape_cast %9 : vector<1x32xf32> to vector<1x32xf32>
    %11 = vector.broadcast %10 : vector<1x32xf32> to vector<16x32xf32>
    %12 = vector.extract_strided_slice %7 {offsets = [0, 0, 0], sizes = [2, 8, 8], strides = [1, 1, 1]} : vector<2x8x96xf32> to vector<2x8x8xf32>
    %cst_10 = arith.constant 0.353553385 : f32
    %13 = vector.broadcast %cst_10 : f32 to vector<2x8x8xf32>
    %14 = arith.mulf %12, %13 : vector<2x8x8xf32>
    %15 = vector.extract_strided_slice %7 {offsets = [0, 0, 32], sizes = [2, 8, 8], strides = [1, 1, 1]} : vector<2x8x96xf32> to vector<2x8x8xf32>
    %16 = vector.extract_strided_slice %7 {offsets = [0, 0, 64], sizes = [2, 8, 8], strides = [1, 1, 1]} : vector<2x8x96xf32> to vector<2x8x8xf32>
    "tpu.trace_start"() <{level = 10 : i32, message = "bqd,bkd->bqk"}> : () -> ()
    %cst_11 = arith.constant dense<0.000000e+00> : vector<2x8x8xf32>
    %17 = tpu.matmul %14, %15, %cst_11 {dimension_numbers = #tpu.dot_dimension_numbers<[2], [2], [1], [1], [0, 0, 0, 1, 1, 1], [0], [0]>} : vector<2x8x8xf32>, vector<2x8x8xf32>, vector<2x8x8xf32> -> vector<2x8x8xf32>
    "tpu.trace_stop"() : () -> ()
    %cst_12 = arith.constant dense<0xFF800000> : vector<2x8xf32>
    %18 = vector.multi_reduction <maximumf>, %17, %cst_12 [2] : vector<2x8x8xf32> to vector<2x8xf32>
    %19 = vector.shape_cast %18 : vector<2x8xf32> to vector<2x8x1xf32>
    %20 = vector.broadcast %19 : vector<2x8x1xf32> to vector<2x8x8xf32>
    %21 = arith.subf %17, %20 : vector<2x8x8xf32>
    %22 = math.exp %21 : vector<2x8x8xf32>
    %cst_13 = arith.constant dense<0.000000e+00> : vector<2x8xf32>
    %23 = vector.multi_reduction <add>, %22, %cst_13 [2] : vector<2x8x8xf32> to vector<2x8xf32>
    %24 = vector.shape_cast %23 : vector<2x8xf32> to vector<2x8x1xf32>
    %25 = tpu.reciprocal %24 : vector<2x8x1xf32> -> vector<2x8x1xf32>
    %26 = vector.broadcast %25 : vector<2x8x1xf32> to vector<2x8x8xf32>
    %27 = arith.mulf %22, %26 : vector<2x8x8xf32>
    "tpu.trace_start"() <{level = 10 : i32, message = "bqk,bkd->bqd"}> : () -> ()
    %cst_14 = arith.constant dense<0.000000e+00> : vector<2x8x8xf32>
    %28 = tpu.matmul %27, %16, %cst_14 {dimension_numbers = #tpu.dot_dimension_numbers<[2], [1], [1], [2], [0, 0, 0, 1, 1, 2], [0], [0]>} : vector<2x8x8xf32>, vector<2x8x8xf32>, vector<2x8x8xf32> -> vector<2x8x8xf32>
    "tpu.trace_stop"() : () -> ()
    %29 = vector.shape_cast %28 : vector<2x8x8xf32> to vector<16x8xf32>
    %30 = vector.extract_strided_slice %8 {offsets = [0, 0], sizes = [8, 32], strides = [1, 1]} : vector<32x32xf32> to vector<8x32xf32>
    %cst_15 = arith.constant dense<0.000000e+00> : vector<16x32xf32>
    %31 = tpu.matmul %29, %30, %cst_15 {dimension_numbers = #tpu.dot_dimension_numbers<[1], [0], [0], [1], [0, 0, 1, 1], [], []>} : vector<16x8xf32>, vector<8x32xf32>, vector<16x32xf32> -> vector<16x32xf32>
    %32 = arith.addf %11, %31 : vector<16x32xf32>
    %33 = vector.extract_strided_slice %7 {offsets = [0, 0, 8], sizes = [2, 8, 8], strides = [1, 1, 1]} : vector<2x8x96xf32> to vector<2x8x8xf32>
    %cst_16 = arith.constant 0.353553385 : f32
    %34 = vector.broadcast %cst_16 : f32 to vector<2x8x8xf32>
    %35 = arith.mulf %33, %34 : vector<2x8x8xf32>
    %36 = vector.extract_strided_slice %7 {offsets = [0, 0, 40], sizes = [2, 8, 8], strides = [1, 1, 1]} : vector<2x8x96xf32> to vector<2x8x8xf32>
    %37 = vector.extract_strided_slice %7 {offsets = [0, 0, 72], sizes = [2, 8, 8], strides = [1, 1, 1]} : vector<2x8x96xf32> to vector<2x8x8xf32>
    "tpu.trace_start"() <{level = 10 : i32, message = "bqd,bkd->bqk"}> : () -> ()
    %cst_17 = arith.constant dense<0.000000e+00> : vector<2x8x8xf32>
    %38 = tpu.matmul %35, %36, %cst_17 {dimension_numbers = #tpu.dot_dimension_numbers<[2], [2], [1], [1], [0, 0, 0, 1, 1, 1], [0], [0]>} : vector<2x8x8xf32>, vector<2x8x8xf32>, vector<2x8x8xf32> -> vector<2x8x8xf32>
    "tpu.trace_stop"() : () -> ()
    %cst_18 = arith.constant dense<0xFF800000> : vector<2x8xf32>
    %39 = vector.multi_reduction <maximumf>, %38, %cst_18 [2] : vector<2x8x8xf32> to vector<2x8xf32>
    %40 = vector.shape_cast %39 : vector<2x8xf32> to vector<2x8x1xf32>
    %41 = vector.broadcast %40 : vector<2x8x1xf32> to vector<2x8x8xf32>
    %42 = arith.subf %38, %41 : vector<2x8x8xf32>
    %43 = math.exp %42 : vector<2x8x8xf32>
    %cst_19 = arith.constant dense<0.000000e+00> : vector<2x8xf32>
    %44 = vector.multi_reduction <add>, %43, %cst_19 [2] : vector<2x8x8xf32> to vector<2x8xf32>
    %45 = vector.shape_cast %44 : vector<2x8xf32> to vector<2x8x1xf32>
    %46 = tpu.reciprocal %45 : vector<2x8x1xf32> -> vector<2x8x1xf32>
    %47 = vector.broadcast %46 : vector<2x8x1xf32> to vector<2x8x8xf32>
    %48 = arith.mulf %43, %47 : vector<2x8x8xf32>
    "tpu.trace_start"() <{level = 10 : i32, message = "bqk,bkd->bqd"}> : () -> ()
    %cst_20 = arith.constant dense<0.000000e+00> : vector<2x8x8xf32>
    %49 = tpu.matmul %48, %37, %cst_20 {dimension_numbers = #tpu.dot_dimension_numbers<[2], [1], [1], [2], [0, 0, 0, 1, 1, 2], [0], [0]>} : vector<2x8x8xf32>, vector<2x8x8xf32>, vector<2x8x8xf32> -> vector<2x8x8xf32>
    "tpu.trace_stop"() : () -> ()
    %50 = vector.shape_cast %49 : vector<2x8x8xf32> to vector<16x8xf32>
    %51 = vector.extract_strided_slice %8 {offsets = [8, 0], sizes = [8, 32], strides = [1, 1]} : vector<32x32xf32> to vector<8x32xf32>
    %cst_21 = arith.constant dense<0.000000e+00> : vector<16x32xf32>
    %52 = tpu.matmul %50, %51, %cst_21 {dimension_numbers = #tpu.dot_dimension_numbers<[1], [0], [0], [1], [0, 0, 1, 1], [], []>} : vector<16x8xf32>, vector<8x32xf32>, vector<16x32xf32> -> vector<16x32xf32>
    %53 = arith.addf %32, %52 : vector<16x32xf32>
    %54 = vector.extract_strided_slice %7 {offsets = [0, 0, 16], sizes = [2, 8, 8], strides = [1, 1, 1]} : vector<2x8x96xf32> to vector<2x8x8xf32>
    %cst_22 = arith.constant 0.353553385 : f32
    %55 = vector.broadcast %cst_22 : f32 to vector<2x8x8xf32>
    %56 = arith.mulf %54, %55 : vector<2x8x8xf32>
    %57 = vector.extract_strided_slice %7 {offsets = [0, 0, 48], sizes = [2, 8, 8], strides = [1, 1, 1]} : vector<2x8x96xf32> to vector<2x8x8xf32>
    %58 = vector.extract_strided_slice %7 {offsets = [0, 0, 80], sizes = [2, 8, 8], strides = [1, 1, 1]} : vector<2x8x96xf32> to vector<2x8x8xf32>
    "tpu.trace_start"() <{level = 10 : i32, message = "bqd,bkd->bqk"}> : () -> ()
    %cst_23 = arith.constant dense<0.000000e+00> : vector<2x8x8xf32>
    %59 = tpu.matmul %56, %57, %cst_23 {dimension_numbers = #tpu.dot_dimension_numbers<[2], [2], [1], [1], [0, 0, 0, 1, 1, 1], [0], [0]>} : vector<2x8x8xf32>, vector<2x8x8xf32>, vector<2x8x8xf32> -> vector<2x8x8xf32>
    "tpu.trace_stop"() : () -> ()
    %cst_24 = arith.constant dense<0xFF800000> : vector<2x8xf32>
    %60 = vector.multi_reduction <maximumf>, %59, %cst_24 [2] : vector<2x8x8xf32> to vector<2x8xf32>
    %61 = vector.shape_cast %60 : vector<2x8xf32> to vector<2x8x1xf32>
    %62 = vector.broadcast %61 : vector<2x8x1xf32> to vector<2x8x8xf32>
    %63 = arith.subf %59, %62 : vector<2x8x8xf32>
    %64 = math.exp %63 : vector<2x8x8xf32>
    %cst_25 = arith.constant dense<0.000000e+00> : vector<2x8xf32>
    %65 = vector.multi_reduction <add>, %64, %cst_25 [2] : vector<2x8x8xf32> to vector<2x8xf32>
    %66 = vector.shape_cast %65 : vector<2x8xf32> to vector<2x8x1xf32>
    %67 = tpu.reciprocal %66 : vector<2x8x1xf32> -> vector<2x8x1xf32>
    %68 = vector.broadcast %67 : vector<2x8x1xf32> to vector<2x8x8xf32>
    %69 = arith.mulf %64, %68 : vector<2x8x8xf32>
    "tpu.trace_start"() <{level = 10 : i32, message = "bqk,bkd->bqd"}> : () -> ()
    %cst_26 = arith.constant dense<0.000000e+00> : vector<2x8x8xf32>
    %70 = tpu.matmul %69, %58, %cst_26 {dimension_numbers = #tpu.dot_dimension_numbers<[2], [1], [1], [2], [0, 0, 0, 1, 1, 2], [0], [0]>} : vector<2x8x8xf32>, vector<2x8x8xf32>, vector<2x8x8xf32> -> vector<2x8x8xf32>
    "tpu.trace_stop"() : () -> ()
    %71 = vector.shape_cast %70 : vector<2x8x8xf32> to vector<16x8xf32>
    %72 = vector.extract_strided_slice %8 {offsets = [16, 0], sizes = [8, 32], strides = [1, 1]} : vector<32x32xf32> to vector<8x32xf32>
    %cst_27 = arith.constant dense<0.000000e+00> : vector<16x32xf32>
    %73 = tpu.matmul %71, %72, %cst_27 {dimension_numbers = #tpu.dot_dimension_numbers<[1], [0], [0], [1], [0, 0, 1, 1], [], []>} : vector<16x8xf32>, vector<8x32xf32>, vector<16x32xf32> -> vector<16x32xf32>
    %74 = arith.addf %53, %73 : vector<16x32xf32>
    %75 = vector.extract_strided_slice %7 {offsets = [0, 0, 24], sizes = [2, 8, 8], strides = [1, 1, 1]} : vector<2x8x96xf32> to vector<2x8x8xf32>
    %cst_28 = arith.constant 0.353553385 : f32
    %76 = vector.broadcast %cst_28 : f32 to vector<2x8x8xf32>
    %77 = arith.mulf %75, %76 : vector<2x8x8xf32>
    %78 = vector.extract_strided_slice %7 {offsets = [0, 0, 56], sizes = [2, 8, 8], strides = [1, 1, 1]} : vector<2x8x96xf32> to vector<2x8x8xf32>
    %79 = vector.extract_strided_slice %7 {offsets = [0, 0, 88], sizes = [2, 8, 8], strides = [1, 1, 1]} : vector<2x8x96xf32> to vector<2x8x8xf32>
    "tpu.trace_start"() <{level = 10 : i32, message = "bqd,bkd->bqk"}> : () -> ()
    %cst_29 = arith.constant dense<0.000000e+00> : vector<2x8x8xf32>
    %80 = tpu.matmul %77, %78, %cst_29 {dimension_numbers = #tpu.dot_dimension_numbers<[2], [2], [1], [1], [0, 0, 0, 1, 1, 1], [0], [0]>} : vector<2x8x8xf32>, vector<2x8x8xf32>, vector<2x8x8xf32> -> vector<2x8x8xf32>
    "tpu.trace_stop"() : () -> ()
    %cst_30 = arith.constant dense<0xFF800000> : vector<2x8xf32>
    %81 = vector.multi_reduction <maximumf>, %80, %cst_30 [2] : vector<2x8x8xf32> to vector<2x8xf32>
    %82 = vector.shape_cast %81 : vector<2x8xf32> to vector<2x8x1xf32>
    %83 = vector.broadcast %82 : vector<2x8x1xf32> to vector<2x8x8xf32>
    %84 = arith.subf %80, %83 : vector<2x8x8xf32>
    %85 = math.exp %84 : vector<2x8x8xf32>
    %cst_31 = arith.constant dense<0.000000e+00> : vector<2x8xf32>
    %86 = vector.multi_reduction <add>, %85, %cst_31 [2] : vector<2x8x8xf32> to vector<2x8xf32>
    %87 = vector.shape_cast %86 : vector<2x8xf32> to vector<2x8x1xf32>
    %88 = tpu.reciprocal %87 : vector<2x8x1xf32> -> vector<2x8x1xf32>
    %89 = vector.broadcast %88 : vector<2x8x1xf32> to vector<2x8x8xf32>
    %90 = arith.mulf %85, %89 : vector<2x8x8xf32>
    "tpu.trace_start"() <{level = 10 : i32, message = "bqk,bkd->bqd"}> : () -> ()
    %cst_32 = arith.constant dense<0.000000e+00> : vector<2x8x8xf32>
    %91 = tpu.matmul %90, %79, %cst_32 {dimension_numbers = #tpu.dot_dimension_numbers<[2], [1], [1], [2], [0, 0, 0, 1, 1, 2], [0], [0]>} : vector<2x8x8xf32>, vector<2x8x8xf32>, vector<2x8x8xf32> -> vector<2x8x8xf32>
    "tpu.trace_stop"() : () -> ()
    %92 = vector.shape_cast %91 : vector<2x8x8xf32> to vector<16x8xf32>
    %93 = vector.extract_strided_slice %8 {offsets = [24, 0], sizes = [8, 32], strides = [1, 1]} : vector<32x32xf32> to vector<8x32xf32>
    %cst_33 = arith.constant dense<0.000000e+00> : vector<16x32xf32>
    %94 = tpu.matmul %92, %93, %cst_33 {dimension_numbers = #tpu.dot_dimension_numbers<[1], [0], [0], [1], [0, 0, 1, 1], [], []>} : vector<16x8xf32>, vector<8x32xf32>, vector<16x32xf32> -> vector<16x32xf32>
    %95 = arith.addf %74, %94 : vector<16x32xf32>
    %96 = arith.addf %1, %95 : vector<16x32xf32>
    %cst_34 = arith.constant dense<0.000000e+00> : vector<16xf32>
    %97 = vector.multi_reduction <add>, %96, %cst_34 [1] : vector<16x32xf32> to vector<16xf32>
    %98 = vector.shape_cast %97 : vector<16xf32> to vector<16x1xf32>
    %cst_35 = arith.constant 3.200000e+01 : f32
    %99 = vector.broadcast %cst_35 : f32 to vector<16x1xf32>
    %100 = arith.divf %98, %99 : vector<16x1xf32>
    %101 = vector.broadcast %100 : vector<16x1xf32> to vector<16x32xf32>
    %102 = arith.subf %96, %101 : vector<16x32xf32>
    %103 = arith.mulf %102, %102 : vector<16x32xf32>
    %cst_36 = arith.constant dense<0.000000e+00> : vector<16xf32>
    %104 = vector.multi_reduction <add>, %103, %cst_36 [1] : vector<16x32xf32> to vector<16xf32>
    %105 = vector.shape_cast %104 : vector<16xf32> to vector<16x1xf32>
    %cst_37 = arith.constant 3.200000e+01 : f32
    %106 = vector.broadcast %cst_37 : f32 to vector<16x1xf32>
    %107 = arith.divf %105, %106 : vector<16x1xf32>
    %108 = vector.broadcast %100 : vector<16x1xf32> to vector<16x32xf32>
    %109 = arith.subf %96, %108 : vector<16x32xf32>
    %cst_38 = arith.constant 9.99999974E-6 : f32
    %110 = vector.broadcast %cst_38 : f32 to vector<16x1xf32>
    %111 = arith.addf %107, %110 : vector<16x1xf32>
    %112 = math.rsqrt %111 : vector<16x1xf32>
    %113 = vector.broadcast %112 : vector<16x1xf32> to vector<16x32xf32>
    %114 = arith.mulf %109, %113 : vector<16x32xf32>
    %c0_39 = arith.constant 0 : index
    %c0_40 = arith.constant 0 : index
    %115 = vector.load %arg5[%c0_39, %c0_40] : memref<1x32xf32, #tpu.memory_space<vmem>>, vector<1x32xf32>
    %116 = vector.broadcast %115 : vector<1x32xf32> to vector<16x32xf32>
    %117 = arith.mulf %114, %116 : vector<16x32xf32>
    %c0_41 = arith.constant 0 : index
    %c0_42 = arith.constant 0 : index
    %118 = vector.load %arg6[%c0_41, %c0_42] : memref<1x32xf32, #tpu.memory_space<vmem>>, vector<1x32xf32>
    %119 = vector.broadcast %118 : vector<1x32xf32> to vector<16x32xf32>
    %120 = arith.addf %117, %119 : vector<16x32xf32>
    %c0_43 = arith.constant 0 : index
    %c0_44 = arith.constant 0 : index
    %121 = vector.load %arg7[%c0_43, %c0_44] : memref<32x32xf32, #tpu.memory_space<vmem>>, vector<32x32xf32>
    %cst_45 = arith.constant dense<0.000000e+00> : vector<16x32xf32>
    %122 = tpu.matmul %120, %121, %cst_45 {dimension_numbers = #tpu.dot_dimension_numbers<[1], [0], [0], [1], [0, 0, 1, 1], [], []>} : vector<16x32xf32>, vector<32x32xf32>, vector<16x32xf32> -> vector<16x32xf32>
    %c0_46 = arith.constant 0 : index
    %c0_47 = arith.constant 0 : index
    %123 = vector.load %arg8[%c0_46, %c0_47] : memref<1x32xf32, #tpu.memory_space<vmem>>, vector<1x32xf32>
    %124 = vector.broadcast %123 : vector<1x32xf32> to vector<16x32xf32>
    %125 = arith.addf %122, %124 : vector<16x32xf32>
    %cst_48 = arith.constant 0.000000e+00 : f32
    %126 = vector.broadcast %cst_48 : f32 to vector<16x32xf32>
    %127 = arith.maximumf %125, %126 : vector<16x32xf32>
    %c0_49 = arith.constant 0 : index
    %c0_50 = arith.constant 0 : index
    %128 = vector.load %arg9[%c0_49, %c0_50] : memref<32x32xf32, #tpu.memory_space<vmem>>, vector<32x32xf32>
    %cst_51 = arith.constant dense<0.000000e+00> : vector<16x32xf32>
    %129 = tpu.matmul %127, %128, %cst_51 {dimension_numbers = #tpu.dot_dimension_numbers<[1], [0], [0], [1], [0, 0, 1, 1], [], []>} : vector<16x32xf32>, vector<32x32xf32>, vector<16x32xf32> -> vector<16x32xf32>
    %c0_52 = arith.constant 0 : index
    %c0_53 = arith.constant 0 : index
    %130 = vector.load %arg10[%c0_52, %c0_53] : memref<1x32xf32, #tpu.memory_space<vmem>>, vector<1x32xf32>
    %131 = vector.broadcast %130 : vector<1x32xf32> to vector<16x32xf32>
    %132 = arith.addf %129, %131 : vector<16x32xf32>
    %133 = arith.addf %120, %132 : vector<16x32xf32>
    %cst_54 = arith.constant dense<0.000000e+00> : vector<16xf32>
    %134 = vector.multi_reduction <add>, %133, %cst_54 [1] : vector<16x32xf32> to vector<16xf32>
    %135 = vector.shape_cast %134 : vector<16xf32> to vector<16x1xf32>
    %cst_55 = arith.constant 3.200000e+01 : f32
    %136 = vector.broadcast %cst_55 : f32 to vector<16x1xf32>
    %137 = arith.divf %135, %136 : vector<16x1xf32>
    %138 = vector.broadcast %137 : vector<16x1xf32> to vector<16x32xf32>
    %139 = arith.subf %133, %138 : vector<16x32xf32>
    %140 = arith.mulf %139, %139 : vector<16x32xf32>
    %cst_56 = arith.constant dense<0.000000e+00> : vector<16xf32>
    %141 = vector.multi_reduction <add>, %140, %cst_56 [1] : vector<16x32xf32> to vector<16xf32>
    %142 = vector.shape_cast %141 : vector<16xf32> to vector<16x1xf32>
    %cst_57 = arith.constant 3.200000e+01 : f32
    %143 = vector.broadcast %cst_57 : f32 to vector<16x1xf32>
    %144 = arith.divf %142, %143 : vector<16x1xf32>
    %145 = vector.broadcast %137 : vector<16x1xf32> to vector<16x32xf32>
    %146 = arith.subf %133, %145 : vector<16x32xf32>
    %cst_58 = arith.constant 9.99999974E-6 : f32
    %147 = vector.broadcast %cst_58 : f32 to vector<16x1xf32>
    %148 = arith.addf %144, %147 : vector<16x1xf32>
    %149 = math.rsqrt %148 : vector<16x1xf32>
    %150 = vector.broadcast %149 : vector<16x1xf32> to vector<16x32xf32>
    %151 = arith.mulf %146, %150 : vector<16x32xf32>
    %c0_59 = arith.constant 0 : index
    %c0_60 = arith.constant 0 : index
    %152 = vector.load %arg11[%c0_59, %c0_60] : memref<1x32xf32, #tpu.memory_space<vmem>>, vector<1x32xf32>
    %153 = vector.broadcast %152 : vector<1x32xf32> to vector<16x32xf32>
    %154 = arith.mulf %151, %153 : vector<16x32xf32>
    %c0_61 = arith.constant 0 : index
    %c0_62 = arith.constant 0 : index
    %155 = vector.load %arg12[%c0_61, %c0_62] : memref<1x32xf32, #tpu.memory_space<vmem>>, vector<1x32xf32>
    %156 = vector.broadcast %155 : vector<1x32xf32> to vector<16x32xf32>
    %157 = arith.addf %154, %156 : vector<16x32xf32>
    %158 = vector.shape_cast %157 : vector<16x32xf32> to vector<2x8x32xf32>
    %c0_63 = arith.constant 0 : index
    %c0_64 = arith.constant 0 : index
    %c0_65 = arith.constant 0 : index
    %159 = vector.load %arg13[%c0_63, %c0_64, %c0_65] : memref<2x8x32xf32, #tpu.memory_space<vmem>>, vector<2x8x32xf32>
    tpu.vector_store %arg13[%c0_63, %c0_64, %c0_65], %158 {strides = array<i32>} : memref<2x8x32xf32, #tpu.memory_space<vmem>>, vector<2x8x32xf32>,
    return
  }
}

</mosaic_0001>

<bundles_post_ra>
// kernel: tpu_custom_call.1
= control target key start
LH: loop header
LB: loop body
LE: loop exit
PB: predicated region body
PF: predicated region fallthrough
CT: control target
= control target key end

     0   :  { %18 = vsyncpa [#allocation3], 0  ;;  %s3124_s0 = inlined_call_operand.hbm [shape: f32[2,8,32], index: 0, kind: input, shape index: {}]   ;;  %s3125_s1 = inlined_call_operand.hbm [shape: f32[32,96], index: 1, kind: input, shape index: {}]   ;;  %s3126_s2 = inlined_call_operand.vmem [shape: f32[1,96], index: 2, kind: input, shape index: {}]   ;;  %s3127_s3 = inlined_call_operand.hbm [shape: f32[32,32], index: 3, kind: input, shape index: {}]   ;;  %s3128_s4 = inlined_call_operand.vmem [shape: f32[1,32], index: 4, kind: input, shape index: {}]   ;;  %s3129_s5 = inlined_call_operand.hbm [shape: f32[1,32], index: 5, kind: input, shape index: {}]   ;;  %s3130_s6 = inlined_call_operand.hbm [shape: f32[1,32], index: 6, kind: input, shape index: {}]   ;;  %s3131_s7 = inlined_call_operand.hbm [shape: f32[32,32], index: 7, kind: input, shape index: {}]   ;;  %s3132_s8 = inlined_call_operand.hbm [shape: f32[1,32], index: 8, kind: input, shape index: {}]   ;;  %s3133_s9 = inlined_call_operand.vmem [shape: f32[32,32], index: 9, kind: input, shape index: {}]   ;;  %s3134_s10 = inlined_call_operand.vmem [shape: f32[1,32], index: 10, kind: input, shape index: {}]   ;;  %s3135_s11 = inlined_call_operand.vmem [shape: f32[1,32], index: 11, kind: input, shape index: {}]   ;;  %s3136_s12 = inlined_call_operand.vmem [shape: f32[1,32], index: 12, kind: input, shape index: {}]   ;;  %s3137_s13 = inlined_call_operand.hbm [shape: f32[2,8,32], index: 13, kind: output, shape index: {}]  }
   0x1   :  { %19 = vsyncpa [#allocation6], 0 }
   0x2   :  { %20 = vsyncpa [#allocation9], 0 }
   0x3   :  { %21 = vsyncpa [#allocation12], 0 }
   0x4   :  { %22 = vsyncpa [#allocation4], 0  ;;  %s2718_s25 = smov [#allocation5]   ;;  %s2719_s27 = smov [#allocation8]  }
   0x5   :  { %s40_s26 = sshll.u32 %s2718_s25, 4  ;;  %s69_s28 = sshll.u32 %s2719_s27, 4  ;;  %s41_s26 = int_to_ptr.vmem [resolvable:$true] %s40_s26  ;;  %s2811_s28 = int_to_ptr.vmem [resolvable:$true] %s69_s28 }
   0x6   :  { %s2532_s14 = scalar_lea.hbm %s3125_s1, 512 }
   0x7   :  { %p2533_p0 = scmp.ne.s32.totalorder %s3125_s1, %s2532_s14  ;;  %p2536_p1 = scmp.lt.u32.totalorder %s2532_s14, %s3125_s1 }
   0x9   :  { %p2538_p2 = pnand %p2536_p1, %p2533_p0 }
   0xb   :  { %2541 = shalt.err (!%p2538_p2)
}
   0xc   :  { %s2542_s19 = scalar_lea.vmem %s41_s26, 512  ;;  %p2547_p4 = scmp.lt.s32.totalorder %s41_s26, %s41_s26 }
   0xd   :  { %p2543_p3 = scmp.ne.s32.totalorder %s41_s26, %s2542_s19  ;;  %p2548_p5 = scmp.lt.s32.totalorder %s2542_s19, %s2542_s19 }
   0xf   :  { %p2549_p6 = por %p2548_p5, %p2547_p4 }
  0x11   :  { %p2550_p7 = pnand %p2549_p6, %p2543_p3 }
  0x13   :  { %2553 = shalt.err (!%p2550_p7)
}
  0x14   :  { %s2720_s20 = smov 128   ;;  %s2721_s21 = smov 8  }
  0x15   :  { %46 = dma.hbm_to_vmem [thread:$0]  %s3125_s1, 512, %s41_s26, [#allocation6], %s2720_s20, %s2720_s20, %s2721_s21  }
  0x16   :  { %s2554_s27 = scalar_lea.hbm %s3129_s5, 16 }
  0x17   :  { %p2555_p8 = scmp.ne.s32.totalorder %s3129_s5, %s2554_s27  ;;  %p2558_p9 = scmp.lt.u32.totalorder %s2554_s27, %s3129_s5 }
  0x19   :  { %p2560_p10 = pnand %p2558_p9, %p2555_p8 }
  0x1b   :  { %2563 = shalt.err (!%p2560_p10)
}
  0x1c   :  { %s2564_s16 = scalar_lea.vmem %s2811_s28, 16  ;;  %s2568_s1 = scalar_lea.vmem %s2811_s28, 32 }
  0x1d   :  { %p2565_p11 = scmp.ne.s32.totalorder %s2811_s28, %s2564_s16  ;;  %p2569_p12 = scmp.lt.s32.totalorder %s2811_s28, %s2811_s28 }
  0x1e   :  { %p2570_p13 = scmp.lt.s32.totalorder %s2568_s1, %s2564_s16 }
  0x20   :  { %p2571_p0 = por %p2570_p13, %p2569_p12 }
  0x22   :  { %p2572_p1 = pnand %p2571_p0, %p2565_p11 }
  0x24   :  { %2575 = shalt.err (!%p2572_p1)
}
  0x25   :  { %72 = dma.hbm_to_vmem [thread:$0]  %s3129_s5, 16, %s2811_s28, [#allocation9]  }
  0x26   :  { %s2722_s18 = smov [#allocation11]   ;;  %s2723_s22 = smov [#allocation2]  }
  0x27   :  { %s88_s19 = sshll.u32 %s2722_s18, 4  ;;  %s28_s23 = sshll.u32 %s2723_s22, 4  ;;  %s89_s19 = int_to_ptr.vmem [resolvable:$true] %s88_s19  ;;  %s2846_s23 = int_to_ptr.vmem [resolvable:$true] %s28_s23 }
  0x28   :  { %s2576_s27 = scalar_lea.hbm %s3131_s7, 512 }
  0x29   :  { %p2577_p2 = scmp.ne.s32.totalorder %s3131_s7, %s2576_s27  ;;  %p2580_p3 = scmp.lt.u32.totalorder %s2576_s27, %s3131_s7 }
  0x2b   :  { %p2582_p4 = pnand %p2580_p3, %p2577_p2 }
  0x2d   :  { %2585 = shalt.err (!%p2582_p4)
}
  0x2e   :  { %s2586_s5 = scalar_lea.vmem %s89_s19, 512  ;;  %p2591_p6 = scmp.lt.s32.totalorder %s89_s19, %s89_s19 }
  0x2f   :  { %p2587_p5 = scmp.ne.s32.totalorder %s89_s19, %s2586_s5  ;;  %p2592_p7 = scmp.lt.s32.totalorder %s2586_s5, %s2586_s5 }
  0x31   :  { %p2593_p8 = por %p2592_p7, %p2591_p6 }
  0x33   :  { %p2594_p9 = pnand %p2593_p8, %p2587_p5 }
  0x35   :  { %2597 = shalt.err (!%p2594_p9)
}
  0x36   :  { %94 = dma.hbm_to_vmem [thread:$0]  %s3131_s7, 512, %s89_s19, [#allocation12], %s2720_s20, %s2720_s20, %s2721_s21  }
  0x37   :  { %s2598_s17 = scalar_lea.hbm %s3124_s0, 256 }
  0x38   :  { %p2599_p10 = scmp.ne.s32.totalorder %s3124_s0, %s2598_s17  ;;  %p2602_p11 = scmp.lt.u32.totalorder %s2598_s17, %s3124_s0 }
  0x3a   :  { %p2604_p12 = pnand %p2602_p11, %p2599_p10 }
  0x3c   :  { %2607 = shalt.err (!%p2604_p12)
}
  0x3d   :  { %s2608_s27 = scalar_lea.vmem %s2846_s23, 256  ;;  %p2613_p0 = scmp.lt.s32.totalorder %s2846_s23, %s2846_s23 }
  0x3e   :  { %p2609_p13 = scmp.ne.s32.totalorder %s2846_s23, %s2608_s27  ;;  %p2614_p1 = scmp.lt.s32.totalorder %s2608_s27, %s2608_s27 }
  0x40   :  { %p2615_p2 = por %p2614_p1, %p2613_p0 }
  0x42   :  { %p2616_p3 = pnand %p2615_p2, %p2609_p13 }
  0x44   :  { %2619 = shalt.err (!%p2616_p3)
}
  0x45   :  { %34 = dma.hbm_to_vmem [thread:$0]  %s3124_s0, 256, %s2846_s23, [#allocation3], %s2720_s20, %s2720_s20, %s2721_s21  }
  0x46   :  { %s2724_s29 = smov [#allocation7]   ;;  %s2725_s14 = smov [#allocation10]  }
  0x47   :  { %s54_s30 = sshll.u32 %s2724_s29, 4  ;;  %s79_s15 = sshll.u32 %s2725_s14, 4  ;;  %s55_s30 = int_to_ptr.vmem [resolvable:$true] %s54_s30  ;;  %s80_s15 = int_to_ptr.vmem [resolvable:$true] %s79_s15 }
  0x48   :  { %s2620_s16 = scalar_lea.hbm %s3127_s3, 512 }
  0x49   :  { %p2621_p4 = scmp.ne.s32.totalorder %s3127_s3, %s2620_s16  ;;  %p2624_p5 = scmp.lt.u32.totalorder %s2620_s16, %s3127_s3 }
  0x4b   :  { %p2626_p6 = pnand %p2624_p5, %p2621_p4 }
  0x4d   :  { %2629 = shalt.err (!%p2626_p6)
}
  0x4e   :  { %s2630_s0 = scalar_lea.vmem %s55_s30, 512  ;;  %p2635_p8 = scmp.lt.s32.totalorder %s55_s30, %s55_s30 }
  0x4f   :  { %p2631_p7 = scmp.ne.s32.totalorder %s55_s30, %s2630_s0  ;;  %p2636_p9 = scmp.lt.s32.totalorder %s2630_s0, %s2630_s0 }
  0x51   :  { %p2637_p10 = por %p2636_p9, %p2635_p8 }
  0x53   :  { %p2638_p11 = pnand %p2637_p10, %p2631_p7 }
  0x55   :  { %2641 = shalt.err (!%p2638_p11)
}
  0x56   :  { %60 = dma.hbm_to_vmem [thread:$0]  %s3127_s3, 512, %s55_s30, [#allocation6], %s2720_s20, %s2720_s20, %s2721_s21  }
  0x57   :  { %s2642_s27 = scalar_lea.hbm %s3130_s6, 16 }
  0x58   :  { %p2643_p12 = scmp.ne.s32.totalorder %s3130_s6, %s2642_s27  ;;  %p2646_p13 = scmp.lt.u32.totalorder %s2642_s27, %s3130_s6 }
  0x5a   :  { %p2648_p0 = pnand %p2646_p13, %p2643_p12 }
  0x5c   :  { %2651 = shalt.err (!%p2648_p0)
}
  0x5d   :  { %s2652_s5 = scalar_lea.vmem %s80_s15, 16  ;;  %s2656_s28 = scalar_lea.vmem %s80_s15, 32 }
  0x5e   :  { %p2653_p1 = scmp.ne.s32.totalorder %s80_s15, %s2652_s5  ;;  %p2657_p2 = scmp.lt.s32.totalorder %s80_s15, %s80_s15 }
  0x5f   :  { %p2658_p3 = scmp.lt.s32.totalorder %s2656_s28, %s2652_s5 }
  0x61   :  { %p2659_p4 = por %p2658_p3, %p2657_p2 }
  0x63   :  { %p2660_p5 = pnand %p2659_p4, %p2653_p1 }
  0x65   :  { %2663 = shalt.err (!%p2660_p5)
}
  0x66   :  { %82 = dma.hbm_to_vmem [thread:$0]  %s3130_s6, 16, %s80_s15, [#allocation9]  }
  0x67   :  { %s2726_s16 = smov [#allocation13]   ;;  %s2664_s18 = scalar_lea.hbm %s3132_s8, 16 }
  0x68   :  { %s101_s1 = sshll.u32 %s2726_s16, 4  ;;  %p2665_p6 = scmp.ne.s32.totalorder %s3132_s8, %s2664_s18  ;;  %s102_s1 = int_to_ptr.vmem [resolvable:$true] %s101_s1 }
  0x69   :  { %p2668_p7 = scmp.lt.u32.totalorder %s2664_s18, %s3132_s8 }
  0x6b   :  { %p2670_p8 = pnand %p2668_p7, %p2665_p6 }
  0x6d   :  { %2673 = shalt.err (!%p2670_p8)
}
  0x6e   :  { %s2674_s25 = scalar_lea.vmem %s102_s1, 16  ;;  %s2678_s6 = scalar_lea.vmem %s102_s1, 32 }
  0x6f   :  { %p2675_p9 = scmp.ne.s32.totalorder %s102_s1, %s2674_s25  ;;  %p2679_p10 = scmp.lt.s32.totalorder %s102_s1, %s102_s1 }
  0x70   :  { %p2680_p11 = scmp.lt.s32.totalorder %s2678_s6, %s2674_s25 }
  0x72   :  { %p2681_p12 = por %p2680_p11, %p2679_p10 }
  0x74   :  { %p2682_p13 = pnand %p2681_p12, %p2675_p9 }
  0x76   :  { %2685 = shalt.err (!%p2682_p13)
}
  0x77   :  { %104 = dma.hbm_to_vmem [thread:$0]  %s3132_s8, 16, %s102_s1, [#allocation12]  }
  0x78   :  { %2708 = dma.done.wait [#allocation3], 256  }
  0x79   :  { %2709 = vsyncadd [#allocation3], 4294967040 }
  0x7a   :  { %2710 = dma.done.wait [#allocation6], 1024  }
  0x7b   :  { %2711 = vsyncadd [#allocation6], 4294966272 }
  0x7c   :  { %2712 = dma.done.wait [#allocation9], 32  }
  0x7d   :  { %2713 = vsyncadd [#allocation9], 4294967264 }
  0x7e   :  { %2714 = dma.done.wait [#allocation12], 528  }
  0x7f   :  { %2715 = vsyncadd [#allocation12], 4294966768  ;;  %vm147_vm0 = vcmask 261120   ;;  %v136_v0 = vld [vmem:[#allocation5] sm:$0xff]  ;;  %v137_v1 = vld [vmem:[#allocation5 + $0x8] sm:$0xff]  ;;  %v2727_v8 = vmov 0.0  }
  0x80   :  { %v138_v2 = vld [vmem:[#allocation5 + $0x10] sm:$0xff]  ;;  %v2437_v3 = vpack.c.bf16 %v137_v1, %v136_v0  ;;  %v139_v4 = vld [vmem:[#allocation5 + $0x18] sm:$0xff]  ;;  %2315 = vmatprep.subr.mxu1 %v2727_v8  ;;  %vm2728_vm1 = vmmov 0   ;;  %s2729_s19 = smov 96   ;;  %vm245_vm2 = vcmask 64512   ;;  %s2731_s29 = smov 88  }
  0x81   :  { %v2922_v5 = vld [vmem:[#allocation2] sm:$0xff]  ;;  %v2441_v6 = vpack.c.bf16 %v139_v4, %v138_v2  ;;  %v2926_v7 = vld [vmem:[#allocation2 + $0x8] sm:$0xff]  ;;  %2317 = vmatprep.mubr.msk.f32.mxu1 %vm2728_vm1, %v2727_v8  ;;  %s2732_s14 = smov 120   ;;  %v229_v35 = vld [vmem:[#allocation7] sm:$0xff]  ;;  %s2733_s5 = smov 56  }
  0x82   :  { %2312 = vmatprep.mubr.msk.f32.mxu0 %vm147_vm0, %v2922_v5  ;;  %2438 = vmatprep.subr.bf16.mxu0 %v2437_v3  ;;  %v2196_v9 = vld [vmem:[%s3126_s2] ss:$0 sm:$0xff]  ;;  %s2730_s2 = smov 64   ;;  %s2734_s28 = smov 112  }
  0x83   :  { %2440 = vmatpush3.bf16.msra.mxu0 %v2437_v3  ;;  %s2735_s3 = smov 80   ;;  %s2736_s30 = smov 48  }
  0x84   :  { %2442 = vmatprep.subr.bf16.mxu0 %v2441_v6  ;;  %s2737_s16 = smov 72   ;;  %s2738_s1 = smov 104  }
  0x85   :  { %s2739_s26 = smov 40  }
  0x87   :  { %2444 = vmatpush3.bf16.msra.mxu0 %v2441_v6 }
  0x88   :  { %2335 = vmatprep.subr.mxu0 %v229_v35 }
  0x8a   :  { %2313 = vmatmul.mubr.msk.f32.vlgmr.msra.gmra.mrb[0].mxu0 %vm147_vm0, %v2926_v7 }
  0x8b   :  { %2336 = vmatpush3.msra.mxu0 %v229_v35 }
  0x8c   :  { %2345 = vmatprep.subr.mxu0 %v2727_v8 }
 0x15d   :  { %v2314_v10 = vpop.f32.mrb[0].mxu0 }
 0x15e   :  { %v220_v11 = vpop.f32.mrb[1].mxu0  ;;  %v2939_v13 = vadd.f32 %v2314_v10, %v2196_v9 }
 0x15f   :  { %v2936_v12 = vadd.f32 %v2196_v9, %v220_v11 }
 0x160   :  { %v2953_v17 = vmul.f32 0.35355338, %v2939_v13 }
 0x161   :  { %243 = vrot.lane.b32.xlu0 %v2936_v12, %s2729_s19  ;;  %v2945_v15 = vmul.f32 0.35355338, %v2936_v12 }
 0x165   :  { %322 = vrot.lane.b32.xlu0 %v2939_v13, %s2729_s19 }
 0x1d3   :  { %v244_v14 = vpop.permute.xlu0 %243 }
 0x1d4   :  { %2316 = vmatpush3.xpose.msk.msra.mxu1 %vm245_vm2, %v244_v14 }
 0x1d5   :  { %2320 = vmatprep.subr.mxu1 %v2727_v8 }
 0x1d7   :  { %v323_v16 = vpop.permute.xlu0 %322  ;;  %2318 = vmatmul.mubr.msk.f32.vlgmr.msra.gmra.mrb[0].mxu1 %vm245_vm2, %v2945_v15 }
 0x1d8   :  { %2321 = vmatpush3.xpose.msk.msra.mxu1 %vm245_vm2, %v323_v16  ;;  %2322 = vmatprep.mubr.msk.f32.mxu1 %vm2728_vm1, %v2727_v8 }
 0x1d9   :  { %2325 = vmatprep.subr.mxu1 %v2727_v8 }
 0x1db   :  { %2323 = vmatmul.mubr.msk.f32.vlgmr.msra.gmra.mrb[2].mxu1 %vm245_vm2, %v2953_v17 }
 0x1dc   :  { %2327 = vmatprep.mubr.msk.f32.mxu1 %vm2728_vm1, %v2727_v8 }
 0x2aa   :  { %v317_v18 = vpop.f32.mrb[0].mxu1 }
 0x2ab   :  { %v2319_v19 = vpop.f32.mrb[1].mxu1  ;;  %v399_v20 = vsel %vm245_vm2, %v317_v18, -inf }
 0x2ac   :  { %400 = vmax.xlane.f32.xlu1 %v399_v20 }
 0x2ae   :  { %v395_v21 = vpop.f32.mrb[2].mxu1 }
 0x2af   :  { %v2324_v22 = vpop.f32.mrb[3].mxu1  ;;  %v402_v23 = vsel %vm245_vm2, %v395_v21, -inf }
 0x2b0   :  { %403 = vmax.xlane.f32.xlu1 %v402_v23 }
 0x2c1   :  { %421 = vrot.lane.b32.xlu1 %v2936_v12, %s2730_s2 }
 0x339   :  { %v401_v24 = vpop.xlane.xlu1 %400 }
 0x33a   :  { %v405_v25 = vsub.f32 %v317_v18, %v401_v24 }
 0x33c   :  { %v407_v26 = vmul.f32 1.442695, %v405_v25 }
 0x33d   :  { %v404_v27 = vpop.xlane.xlu1 %403 }
 0x33e   :  { %2492 = vpow2.f32 %v407_v26  ;;  %v406_v28 = vsub.f32 %v395_v21, %v404_v27 }
 0x340   :  { %v409_v29 = vmul.f32 1.442695, %v406_v28 }
 0x341   :  { %v422_v30 = vpop.permute.xlu1 %421 }
 0x342   :  { %2494 = vpow2.f32 %v409_v29  ;;  %2326 = vmatpush3.msra.mxu1 %v422_v30  ;;  %v230_v30 = vld [vmem:[#allocation7 + $0x8] sm:$0xff] }
 0x343   :  { %2330 = vmatprep.subr.mxu1 %v2727_v8 }
 0x348   :  { %v2493_v31 = vpop.eup %2492 }
 0x349   :  { %v411_v32 = vsel %vm245_vm2, %v2493_v31, 0.0 }
 0x34a   :  { %412 = vadd.xlane.f32.xlu0 %v411_v32 }
 0x34c   :  { %v2495_v33 = vpop.eup %2494 }
 0x34d   :  { %v414_v34 = vsel %vm245_vm2, %v2495_v33, 0.0 }
 0x34e   :  { %415 = vadd.xlane.f32.xlu1 %v414_v34 }
 0x35f   :  { %497 = vrot.lane.b32.xlu1 %v2939_v13, %s2730_s2  ;;  %s2740_s2 = smov [#allocation14]  }
 0x360   :  { %736 = vrot.lane.b32.xlu0 %v2939_v13, %s2731_s29 }
 0x363   :  { %658 = vrot.lane.b32.xlu1 %v2936_v12, %s2731_s29  ;;  %s2181_s29 = sshll.u32 %s2740_s2, 4  ;;  %s2182_s29 = int_to_ptr.vmem [resolvable:$true] %s2181_s29 }
 0x364   :  { %p2691_p1 = scmp.lt.s32.totalorder %s2182_s29, %s2182_s29 }
 0x367   :  { %656 = vrot.lane.b32.xlu1 %v2945_v15, %s2732_s14 }
 0x36b   :  { %734 = vrot.lane.b32.xlu1 %v2953_v17, %s2732_s14  ;;  %s2686_s14 = scalar_lea.vmem %s2182_s29, 256 }
 0x36c   :  { %p2687_p0 = scmp.ne.s32.totalorder %s2182_s29, %s2686_s14  ;;  %p2692_p2 = scmp.lt.s32.totalorder %s2686_s14, %s2686_s14 }
 0x36e   :  { %p2693_p3 = por %p2692_p2, %p2691_p1 }
 0x370   :  { %p2694_p4 = pnand %p2693_p3, %p2687_p0 }
 0x3d7   :  { %v413_v36 = vpop.xlane.xlu0 %412 }
 0x3d8   :  { %2496 = vrcp.f32 %v413_v36 }
 0x3db   :  { %v416_v37 = vpop.xlane.xlu1 %415  ;;  %v737_v48 = vpop.permute.xlu0 %736 }
 0x3dc   :  { %2498 = vrcp.f32 %v416_v37 }
 0x3df   :  { %v498_v40 = vpop.permute.xlu1 %497 }
 0x3e2   :  { %v2497_v38 = vpop.eup %2496 }
 0x3e3   :  { %v419_v39 = vmul.f32 %v2497_v38, %v2493_v31  ;;  %v659_v43 = vpop.permute.xlu1 %658 }
 0x3e5   :  { %2328 = vmatmul.mubr.msk.f32.vlgmr.msra.gmra.mrb[4].mxu1 %vm245_vm2, %v419_v39 }
 0x3e6   :  { %v2499_v41 = vpop.eup %2498  ;;  %2331 = vmatpush3.msra.mxu1 %v498_v40  ;;  %2332 = vmatprep.mubr.msk.f32.mxu1 %vm2728_vm1, %v2727_v8 }
 0x3e7   :  { %v420_v42 = vmul.f32 %v2499_v41, %v2495_v33  ;;  %2340 = vmatprep.subr.mxu1 %v2727_v8  ;;  %v657_v44 = vpop.permute.xlu1 %656 }
 0x3e9   :  { %2333 = vmatmul.mubr.msk.f32.vlgmr.msra.gmra.mrb[6].mxu1 %vm245_vm2, %v420_v42 }
 0x3ea   :  { %2342 = vmatprep.mubr.msk.f32.mxu1 %vm2728_vm1, %v2727_v8 }
 0x3eb   :  { %v735_v50 = vpop.permute.xlu1 %734 }
 0x3ed   :  { %2341 = vmatpush3.xpose.msk.msra.mxu1 %vm245_vm2, %v659_v43 }
 0x3ee   :  { %2350 = vmatprep.subr.mxu1 %v2727_v8 }
 0x3f0   :  { %2343 = vmatmul.mubr.msk.f32.vlgmr.msra.gmra.mrb[8].mxu1 %vm245_vm2, %v657_v44 }
 0x3f1   :  { %2352 = vmatprep.mubr.msk.f32.mxu1 %vm2728_vm1, %v2727_v8 }
 0x4b8   :  { %v493_v45 = vpop.f32.mrb[4].mxu1 }
 0x4b9   :  { %v2329_v46 = vpop.f32.mrb[5].mxu1  ;;  %2337 = vmatprep.mubr.msk.f32.mxu0 %vm245_vm2, %v493_v45  ;;  %v231_v45 = vld [vmem:[#allocation7 + $0x10] sm:$0xff] }
 0x4bc   :  { %v569_v47 = vpop.f32.mrb[6].mxu1 }
 0x4bd   :  { %v2334_v49 = vpop.f32.mrb[7].mxu1  ;;  %2338 = vmatmul.mubr.msk.f32.vlgmr.msra.gmra.mrb[2].mxu0 %vm245_vm2, %v569_v47 }
 0x4be   :  { %2346 = vmatpush3.xpose.msk.msra.mxu0 %vm245_vm2, %v737_v48  ;;  %2347 = vmatprep.mubr.msk.f32.mxu0 %vm2728_vm1, %v2727_v8 }
 0x4bf   :  { %2355 = vmatprep.subr.mxu0 %v2727_v8 }
 0x4c1   :  { %2348 = vmatmul.mubr.msk.f32.vlgmr.msra.gmra.mrb[4].mxu0 %vm245_vm2, %v735_v50 }
 0x4c2   :  { %2357 = vmatprep.mubr.msk.f32.mxu0 %vm2728_vm1, %v2727_v8 }
 0x4c3   :  { %v730_v51 = vpop.f32.mrb[8].mxu1 }
 0x4c4   :  { %v2344_v52 = vpop.f32.mrb[9].mxu1  ;;  %v812_v53 = vsel %vm245_vm2, %v730_v51, -inf }
 0x4c5   :  { %813 = vmax.xlane.f32.xlu1 %v812_v53 }
 0x4d6   :  { %834 = vrot.lane.b32.xlu1 %v2936_v12, %s2733_s5 }
 0x4da   :  { %1069 = vrot.lane.b32.xlu1 %v2945_v15, %s2734_s28 }
 0x4de   :  { %1149 = vrot.lane.b32.xlu1 %v2939_v13, %s2735_s3 }
 0x4e2   :  { %1147 = vrot.lane.b32.xlu1 %v2953_v17, %s2734_s28 }
 0x552   :  { %v814_v54 = vpop.xlane.xlu1 %813 }
 0x553   :  { %v818_v55 = vsub.f32 %v730_v51, %v814_v54 }
 0x555   :  { %v820_v56 = vmul.f32 1.442695, %v818_v55 }
 0x556   :  { %v835_v57 = vpop.permute.xlu1 %834 }
 0x557   :  { %2500 = vpow2.f32 %v820_v56  ;;  %2351 = vmatpush3.msra.mxu1 %v835_v57 }
 0x558   :  { %2365 = vmatprep.subr.mxu1 %v2727_v8 }
 0x55a   :  { %v1070_v0 = vpop.permute.xlu1 %1069 }
 0x55e   :  { %v1150_v4 = vpop.permute.xlu1 %1149 }
 0x561   :  { %v2501_v58 = vpop.eup %2500 }
 0x562   :  { %v824_v59 = vsel %vm245_vm2, %v2501_v58, 0.0  ;;  %v1148_v6 = vpop.permute.xlu1 %1147 }
 0x563   :  { %825 = vadd.xlane.f32.xlu0 %v824_v59 }
 0x579   :  { %1071 = vrot.lane.b32.xlu0 %v2936_v12, %s2735_s3 }
 0x594   :  { %v808_v60 = vpop.f32.mrb[4].mxu0 }
 0x595   :  { %v2349_v61 = vpop.f32.mrb[5].mxu0  ;;  %v815_v62 = vsel %vm245_vm2, %v808_v60, -inf }
 0x596   :  { %816 = vmax.xlane.f32.xlu1 %v815_v62 }
 0x5f0   :  { %v826_v63 = vpop.xlane.xlu0 %825 }
 0x5f1   :  { %2502 = vrcp.f32 %v826_v63 }
 0x5f4   :  { %v1072_v3 = vpop.permute.xlu0 %1071 }
 0x5fb   :  { %v2503_v1 = vpop.eup %2502 }
 0x5fc   :  { %v832_v2 = vmul.f32 %v2503_v1, %v2501_v58 }
 0x5fe   :  { %2353 = vmatmul.mubr.msk.f32.vlgmr.msra.gmra.mrb[10].mxu1 %vm245_vm2, %v832_v2 }
 0x5ff   :  { %2366 = vmatpush3.xpose.msk.msra.mxu1 %vm245_vm2, %v1072_v3  ;;  %2367 = vmatprep.mubr.msk.f32.mxu1 %vm2728_vm1, %v2727_v8 }
 0x600   :  { %2370 = vmatprep.subr.mxu1 %v2727_v8 }
 0x602   :  { %2368 = vmatmul.mubr.msk.f32.vlgmr.msra.gmra.mrb[12].mxu1 %vm245_vm2, %v1070_v0 }
 0x603   :  { %2371 = vmatpush3.xpose.msk.msra.mxu1 %vm245_vm2, %v1150_v4  ;;  %2372 = vmatprep.mubr.msk.f32.mxu1 %vm2728_vm1, %v2727_v8 }
 0x604   :  { %2380 = vmatprep.subr.mxu1 %v2727_v8 }
 0x606   :  { %2373 = vmatmul.mubr.msk.f32.vlgmr.msra.gmra.mrb[14].mxu1 %vm245_vm2, %v1148_v6 }
 0x607   :  { %2382 = vmatprep.mubr.msk.f32.mxu1 %vm2728_vm1, %v2727_v8 }
 0x623   :  { %v817_v9 = vpop.xlane.xlu1 %816 }
 0x624   :  { %v819_v10 = vsub.f32 %v808_v60, %v817_v9 }
 0x626   :  { %v822_v11 = vmul.f32 1.442695, %v819_v10 }
 0x628   :  { %2504 = vpow2.f32 %v822_v11 }
 0x632   :  { %v2505_v14 = vpop.eup %2504 }
 0x633   :  { %v827_v16 = vsel %vm245_vm2, %v2505_v14, 0.0 }
 0x634   :  { %828 = vadd.xlane.f32.xlu0 %v827_v16 }
 0x64a   :  { %910 = vrot.lane.b32.xlu0 %v2939_v13, %s2733_s5 }
 0x64e   :  { %1323 = vrot.lane.b32.xlu0 %v2939_v13, %s2736_s30 }
 0x652   :  { %1484 = vrot.lane.b32.xlu0 %v2936_v12, %s2737_s16 }
 0x656   :  { %1562 = vrot.lane.b32.xlu0 %v2939_v13, %s2737_s16 }
 0x65a   :  { %1482 = vrot.lane.b32.xlu0 %v2945_v15, %s2738_s1 }
 0x6c1   :  { %v829_v18 = vpop.xlane.xlu0 %828 }
 0x6c2   :  { %2506 = vrcp.f32 %v829_v18 }
 0x6c5   :  { %v911_v19 = vpop.permute.xlu0 %910 }
 0x6c6   :  { %2356 = vmatpush3.msra.mxu0 %v911_v19 }
 0x6c7   :  { %2360 = vmatprep.subr.mxu0 %v230_v30 }
 0x6c9   :  { %v1324_v20 = vpop.permute.xlu0 %1323 }
 0x6ca   :  { %2381 = vmatpush3.msra.mxu1 %v1324_v20 }
 0x6cb   :  { %2390 = vmatprep.subr.mxu1 %v2727_v8 }
 0x6cc   :  { %v2507_v21 = vpop.eup %2506 }
 0x6cd   :  { %v833_v22 = vmul.f32 %v2507_v21, %v2505_v14  ;;  %v1485_v47 = vpop.permute.xlu0 %1484 }
 0x6cf   :  { %2358 = vmatmul.mubr.msk.f32.vlgmr.msra.gmra.mrb[6].mxu0 %vm245_vm2, %v833_v22 }
 0x6d0   :  { %2361 = vmatpush3.msra.mxu0 %v230_v30 }
 0x6d1   :  { %v906_v23 = vpop.f32.mrb[10].mxu1  ;;  %2375 = vmatprep.subr.mxu0 %v2727_v8  ;;  %v1563_v50 = vpop.permute.xlu0 %1562 }
 0x6d2   :  { %v2354_v24 = vpop.f32.mrb[11].mxu1  ;;  %2362 = vmatprep.mubr.msk.f32.mxu0 %vm245_vm2, %v906_v23 }
 0x6d5   :  { %v1143_v25 = vpop.f32.mrb[12].mxu1  ;;  %v1483_v52 = vpop.permute.xlu0 %1482 }
 0x6d6   :  { %v2369_v26 = vpop.f32.mrb[13].mxu1  ;;  %v1225_v15 = vsel %vm245_vm2, %v1143_v25, -inf }
 0x6d7   :  { %1226 = vmax.xlane.f32.xlu1 %v1225_v15 }
 0x6d9   :  { %v1221_v27 = vpop.f32.mrb[14].mxu1 }
 0x6da   :  { %v2374_v28 = vpop.f32.mrb[15].mxu1  ;;  %v1228_v29 = vsel %vm245_vm2, %v1221_v27, -inf }
 0x6db   :  { %1229 = vmax.xlane.f32.xlu1 %v1228_v29 }
 0x764   :  { %v1227_v31 = vpop.xlane.xlu1 %1226 }
 0x765   :  { %v1231_v32 = vsub.f32 %v1143_v25, %v1227_v31 }
 0x767   :  { %v1233_v33 = vmul.f32 1.442695, %v1231_v32 }
 0x768   :  { %v1230_v34 = vpop.xlane.xlu1 %1229 }
 0x769   :  { %2508 = vpow2.f32 %v1233_v33  ;;  %v1232_v35 = vsub.f32 %v1221_v27, %v1230_v34 }
 0x76b   :  { %v1235_v36 = vmul.f32 1.442695, %v1232_v35 }
 0x76d   :  { %2510 = vpow2.f32 %v1235_v36 }
 0x773   :  { %v2509_v37 = vpop.eup %2508 }
 0x774   :  { %v1237_v38 = vsel %vm245_vm2, %v2509_v37, 0.0 }
 0x775   :  { %1238 = vadd.xlane.f32.xlu1 %v1237_v38 }
 0x777   :  { %v2511_v39 = vpop.eup %2510 }
 0x778   :  { %v1240_v40 = vsel %vm245_vm2, %v2511_v39, 0.0 }
 0x779   :  { %1241 = vadd.xlane.f32.xlu1 %v1240_v40 }
 0x78a   :  { %1247 = vrot.lane.b32.xlu1 %v2936_v12, %s2736_s30 }
 0x78e   :  { %1560 = vrot.lane.b32.xlu1 %v2953_v17, %s2738_s1 }
 0x7a2   :  { %v982_v41 = vpop.f32.mrb[6].mxu0 }
 0x7a3   :  { %v2359_v42 = vpop.f32.mrb[7].mxu0  ;;  %2363 = vmatmul.mubr.msk.f32.vlgmr.msra.gmra.mrb[2].mxu0 %vm245_vm2, %v982_v41 }
 0x7a4   :  { %2377 = vmatprep.mubr.msk.f32.mxu0 %vm2728_vm1, %v2727_v8 }
 0x802   :  { %v1239_v43 = vpop.xlane.xlu1 %1238 }
 0x803   :  { %2512 = vrcp.f32 %v1239_v43 }
 0x806   :  { %v1242_v44 = vpop.xlane.xlu1 %1241 }
 0x807   :  { %2514 = vrcp.f32 %v1242_v44  ;;  %v1943_v44 = vld [vmem:[#allocation11 + $0x8] sm:$0xff] }
 0x80a   :  { %v1248_v46 = vpop.permute.xlu1 %1247 }
 0x80b   :  { %2376 = vmatpush3.msra.mxu0 %v1248_v46  ;;  %v1944_v46 = vld [vmem:[#allocation11 + $0x10] sm:$0xff] }
 0x80c   :  { %2385 = vmatprep.subr.mxu0 %v231_v45 }
 0x80d   :  { %v2513_v48 = vpop.eup %2512 }
 0x80e   :  { %v1245_v49 = vmul.f32 %v2513_v48, %v2509_v37  ;;  %v1561_v57 = vpop.permute.xlu1 %1560 }
 0x810   :  { %2378 = vmatmul.mubr.msk.f32.vlgmr.msra.gmra.mrb[8].mxu0 %vm245_vm2, %v1245_v49  ;;  %v2036_v49 = vld [vmem:[%s3133_s9] sm:$0xff] }
 0x811   :  { %v2515_v17 = vpop.eup %2514  ;;  %2386 = vmatpush3.msra.mxu0 %v231_v45 }
 0x812   :  { %v1246_v51 = vmul.f32 %v2515_v17, %v2511_v39  ;;  %2395 = vmatprep.subr.mxu0 %v2727_v8  ;;  %v2037_v17 = vld [vmem:[%s3133_s9 + $0x8] sm:$0xff] }
 0x814   :  { %2383 = vmatmul.mubr.msk.f32.vlgmr.msra.gmra.mrb[16].mxu1 %vm245_vm2, %v1246_v51 }
 0x815   :  { %2391 = vmatpush3.xpose.msk.msra.mxu1 %vm245_vm2, %v1485_v47  ;;  %2392 = vmatprep.mubr.msk.f32.mxu1 %vm2728_vm1, %v2727_v8  ;;  %v1945_v47 = vld [vmem:[#allocation11 + $0x18] sm:$0xff] }
 0x816   :  { %2400 = vmatprep.subr.mxu1 %v2727_v8  ;;  %v2449_v48 = vpack.c.bf16 %v1945_v47, %v1944_v46 }
 0x818   :  { %2393 = vmatmul.mubr.msk.f32.vlgmr.msra.gmra.mrb[18].mxu1 %vm245_vm2, %v1483_v52 }
 0x819   :  { %2402 = vmatprep.mubr.msk.f32.mxu1 %vm2728_vm1, %v2727_v8 }
 0x8e3   :  { %v1319_v53 = vpop.f32.mrb[8].mxu0 }
 0x8e4   :  { %v2379_v54 = vpop.f32.mrb[9].mxu0  ;;  %2387 = vmatprep.mubr.msk.f32.mxu0 %vm245_vm2, %v1319_v53 }
 0x8e7   :  { %v1395_v55 = vpop.f32.mrb[16].mxu1 }
 0x8e8   :  { %v2384_v56 = vpop.f32.mrb[17].mxu1  ;;  %2388 = vmatmul.mubr.msk.f32.vlgmr.msra.gmra.mrb[2].mxu0 %vm245_vm2, %v1395_v55 }
 0x8e9   :  { %2396 = vmatpush3.xpose.msk.msra.mxu0 %vm245_vm2, %v1563_v50  ;;  %2397 = vmatprep.mubr.msk.f32.mxu0 %vm2728_vm1, %v2727_v8  ;;  %v2453_v50 = vpack.c.bf16 %v2037_v17, %v2036_v49 }
 0x8ea   :  { %2405 = vmatprep.subr.mxu0 %v2727_v8 }
 0x8eb   :  { %v1556_v58 = vpop.f32.mrb[18].mxu1 }
 0x8ec   :  { %v2394_v59 = vpop.f32.mrb[19].mxu1  ;;  %2398 = vmatmul.mubr.msk.f32.vlgmr.msra.gmra.mrb[10].mxu0 %vm245_vm2, %v1561_v57  ;;  %v1638_v60 = vsel %vm245_vm2, %v1556_v58, -inf }
 0x8ed   :  { %1639 = vmax.xlane.f32.xlu0 %v1638_v60  ;;  %2407 = vmatprep.mubr.msk.f32.mxu0 %vm2728_vm1, %v2727_v8 }
 0x97a   :  { %v1640_v61 = vpop.xlane.xlu0 %1639 }
 0x97b   :  { %v1644_v62 = vsub.f32 %v1556_v58, %v1640_v61  ;;  %v2232_v58 = vld [vmem:[#allocation8] ss:$0 sm:$0xff] }
 0x97d   :  { %v1646_v63 = vmul.f32 1.442695, %v1644_v62 }
 0x97f   :  { %2516 = vpow2.f32 %v1646_v63  ;;  %v2233_v63 = vld [vmem:[#allocation10] ss:$0 sm:$0xff] }
 0x989   :  { %v2517_v0 = vpop.eup %2516 }
 0x98a   :  { %v1650_v1 = vsel %vm245_vm2, %v2517_v0, 0.0 }
 0x98b   :  { %1651 = vadd.xlane.f32.xlu0 %v1650_v1 }
 0x9bf   :  { %v1634_v2 = vpop.f32.mrb[10].mxu0 }
 0x9c0   :  { %v2399_v3 = vpop.f32.mrb[11].mxu0  ;;  %v1641_v4 = vsel %vm245_vm2, %v1634_v2, -inf }
 0x9c1   :  { %1642 = vmax.xlane.f32.xlu1 %v1641_v4  ;;  %v2038_v3 = vld [vmem:[%s3133_s9 + $0x10] sm:$0xff]  ;;  %v2039_v4 = vld [vmem:[%s3133_s9 + $0x18] sm:$0xff] }
 0x9d2   :  { %1660 = vrot.lane.b32.xlu1 %v2936_v12, %s2739_s26  ;;  %v232_v12 = vld [vmem:[#allocation7 + $0x18] sm:$0xff] }
 0xa18   :  { %v1652_v6 = vpop.xlane.xlu0 %1651 }
 0xa19   :  { %2518 = vrcp.f32 %v1652_v6  ;;  %v2457_v6 = vpack.c.bf16 %v2039_v4, %v2038_v3 }
 0xa23   :  { %v2519_v8 = vpop.eup %2518 }
 0xa24   :  { %v1658_v14 = vmul.f32 %v2519_v8, %v2517_v0 }
 0xa4e   :  { %v1643_v9 = vpop.xlane.xlu1 %1642 }
 0xa4f   :  { %v1645_v10 = vsub.f32 %v1634_v2, %v1643_v9  ;;  %v2234_v9 = vld [vmem:[#allocation13] ss:$0 sm:$0xff] }
 0xa51   :  { %v1648_v11 = vmul.f32 1.442695, %v1645_v10 }
 0xa52   :  { %v1661_v16 = vpop.permute.xlu1 %1660 }
 0xa53   :  { %2520 = vpow2.f32 %v1648_v11  ;;  %2401 = vmatpush3.msra.mxu1 %v1661_v16 }
 0xa54   :  { %2403 = vmatmul.mubr.msk.f32.vlgmr.msra.gmra.mrb[20].mxu1 %vm245_vm2, %v1658_v14 }
 0xa5d   :  { %v2521_v18 = vpop.eup %2520 }
 0xa5e   :  { %v1653_v19 = vsel %vm245_vm2, %v2521_v18, 0.0 }
 0xa5f   :  { %1654 = vadd.xlane.f32.xlu0 %v1653_v19  ;;  %v2237_v19 = vld [vmem:[%s3134_s10] ss:$0 sm:$0xff] }
 0xa75   :  { %1736 = vrot.lane.b32.xlu0 %v2939_v13, %s2739_s26  ;;  %v2199_v13 = vld [vmem:[%s3128_s4] ss:$0 sm:$0xff] }
 0xaec   :  { %v1655_v20 = vpop.xlane.xlu0 %1654 }
 0xaed   :  { %2522 = vrcp.f32 %v1655_v20 }
 0xaf0   :  { %v1737_v21 = vpop.permute.xlu0 %1736 }
 0xaf1   :  { %2406 = vmatpush3.msra.mxu0 %v1737_v21 }
 0xaf2   :  { %2410 = vmatprep.subr.mxu0 %v232_v12 }
 0xaf7   :  { %v2523_v22 = vpop.eup %2522 }
 0xaf8   :  { %v1659_v23 = vmul.f32 %v2523_v22, %v2521_v18 }
 0xafa   :  { %2408 = vmatmul.mubr.msk.f32.vlgmr.msra.gmra.mrb[12].mxu0 %vm245_vm2, %v1659_v23 }
 0xafb   :  { %2411 = vmatpush3.msra.mxu0 %v232_v12 }
 0xafc   :  { %2454 = vmatprep.subr.bf16.mxu0 %v2453_v50 }
 0xb27   :  { %v1732_v24 = vpop.f32.mrb[20].mxu1 }
 0xb28   :  { %v2404_v25 = vpop.f32.mrb[21].mxu1  ;;  %2412 = vmatprep.mubr.msk.f32.mxu0 %vm245_vm2, %v1732_v24 }
 0xbcd   :  { %v1808_v26 = vpop.f32.mrb[12].mxu0 }
 0xbce   :  { %v2409_v15 = vpop.f32.mrb[13].mxu0  ;;  %2413 = vmatmul.mubr.msk.f32.vlgmr.msra.gmra.mrb[2].mxu0 %vm245_vm2, %v1808_v26 }
 0xbcf   :  { %2456 = vmatpush3.bf16.msra.mxu0 %v2453_v50 }
 0xbd0   :  { %2458 = vmatprep.subr.bf16.mxu0 %v2457_v6 }
 0xbd3   :  { %2460 = vmatpush3.bf16.msra.mxu0 %v2457_v6 }
 0xca1   :  { %v2414_v27 = vpop.f32.mrb[2].mxu0 }
 0xca2   :  { %v2461_v28 = vadd.f32 %v2414_v27, %v2199_v13  ;;  %v1884_v29 = vpop.f32.mrb[3].mxu0 }
 0xca3   :  { %v2462_v30 = vadd.f32 %v2199_v13, %v1884_v29 }
 0xca4   :  { %v1896_v31 = vadd.f32 %v2461_v28, %v2926_v7 }
 0xca5   :  { %v1895_v32 = vadd.f32 %v2462_v30, %v2922_v5  ;;  %v1942_v5 = vld [vmem:[#allocation11] sm:$0xff] }
 0xca6   :  { %v1900_v33 = vsel %vm147_vm0, %v1896_v31, 0.0  ;;  %v2445_v45 = vpack.c.bf16 %v1943_v44, %v1942_v5  ;;  %v2241_v44 = vld [vmem:[%s3136_s12] ss:$0 sm:$0xff] }
 0xca7   :  { %1901 = vadd.xlane.f32.xlu0 %v1900_v33  ;;  %v1897_v34 = vsel %vm147_vm0, %v1895_v32, 0.0 }
 0xca8   :  { %1898 = vadd.xlane.f32.xlu1 %v1897_v34  ;;  %2446 = vmatprep.subr.bf16.mxu1 %v2445_v45 }
 0xca9   :  { %2448 = vmatpush3.bf16.msra.mxu1 %v2445_v45 }
 0xcaa   :  { %2450 = vmatprep.subr.bf16.mxu1 %v2449_v48 }
 0xcad   :  { %2452 = vmatpush3.bf16.msra.mxu1 %v2449_v48 }
 0xd34   :  { %v1902_v35 = vpop.xlane.xlu0 %1901 }
 0xd35   :  { %v1905_v36 = vmul.f32 0.03125, %v1902_v35  ;;  %v1899_v37 = vpop.xlane.xlu1 %1898 }
 0xd36   :  { %v1904_v38 = vmul.f32 0.03125, %v1899_v37 }
 0xd37   :  { %v1907_v39 = vsub.f32 %v1896_v31, %v1905_v36 }
 0xd38   :  { %v1906_v40 = vsub.f32 %v1895_v32, %v1904_v38 }
 0xd39   :  { %v1909_v41 = vmul.f32 %v1907_v39, %v1907_v39 }
 0xd3a   :  { %v1908_v42 = vmul.f32 %v1906_v40, %v1906_v40 }
 0xd3b   :  { %v1913_v43 = vsel %vm147_vm0, %v1909_v41, 0.0 }
 0xd3c   :  { %1914 = vadd.xlane.f32.xlu0 %v1913_v43  ;;  %v1910_v7 = vsel %vm147_vm0, %v1908_v42, 0.0  ;;  %v2240_v42 = vld [vmem:[%s3135_s11] ss:$0 sm:$0xff] }
 0xd3d   :  { %1911 = vadd.xlane.f32.xlu1 %v1910_v7 }
 0xdc9   :  { %v1915_v51 = vpop.xlane.xlu0 %1914 }
 0xdca   :  { %v1917_v52 = vmul.f32 0.03125, %v1915_v51  ;;  %v1912_v53 = vpop.xlane.xlu1 %1911 }
 0xdcb   :  { %v1916_v54 = vmul.f32 0.03125, %v1912_v53 }
 0xdcc   :  { %v1919_v55 = vadd.f32 1e-05, %v1917_v52 }
 0xdcd   :  { %v1918_v56 = vadd.f32 1e-05, %v1916_v54 }
 0xdce   :  { %2524 = vrsqrt.f32 %v1919_v55 }
 0xdcf   :  { %2526 = vrsqrt.f32 %v1918_v56 }
 0xdd8   :  { %v2525_v57 = vpop.eup %2524 }
 0xdd9   :  { %v2527_v59 = vpop.eup %2526  ;;  %v1923_v60 = vmul.f32 %v2525_v57, %v1907_v39 }
 0xdda   :  { %v1922_v61 = vmul.f32 %v2527_v59, %v1906_v40 }
 0xddb   :  { %v1932_v62 = vmul.f32 %v2232_v58, %v1923_v60 }
 0xddc   :  { %v1931_v0 = vmul.f32 %v2232_v58, %v1922_v61 }
 0xddd   :  { %v1941_v2 = vadd.f32 %v2233_v63, %v1932_v62 }
 0xdde   :  { %v1940_v1 = vadd.f32 %v2233_v63, %v1931_v0 }
 0xde0   :  { %2423 = vmatprep.mubr.msk.f32.mxu1 %vm147_vm0, %v1940_v1 }
 0xde1   :  { %2424 = vmatmul.mubr.msk.f32.vlgmr.msra.gmra.mrb[22].mxu1 %vm147_vm0, %v1941_v2 }
 0xeb4   :  { %v2425_v8 = vpop.f32.mrb[22].mxu1 }
 0xeb5   :  { %v2031_v10 = vadd.f32 %v2425_v8, %v2234_v9  ;;  %v2025_v11 = vpop.f32.mrb[23].mxu1 }
 0xeb6   :  { %v2026_v14 = vadd.f32 %v2234_v9, %v2025_v11 }
 0xeb7   :  { %v2035_v18 = vmax.f32 %v2031_v10, 0.0 }
 0xeb8   :  { %v2034_v16 = vmax.f32 %v2026_v14, 0.0 }
 0xeba   :  { %2434 = vmatprep.mubr.msk.f32.mxu0 %vm147_vm0, %v2034_v16 }
 0xebb   :  { %2435 = vmatmul.mubr.msk.f32.vlgmr.msra.gmra.mrb[14].mxu0 %vm147_vm0, %v2035_v18 }
 0xf8e   :  { %v2436_v20 = vpop.f32.mrb[14].mxu0 }
 0xf8f   :  { %v2125_v12 = vadd.f32 %v2436_v20, %v2237_v19  ;;  %v2119_v21 = vpop.f32.mrb[15].mxu0 }
 0xf90   :  { %v2120_v22 = vadd.f32 %v2237_v19, %v2119_v21 }
 0xf91   :  { %v2129_v23 = vadd.f32 %v2125_v12, %v1941_v2 }
 0xf92   :  { %v2128_v24 = vadd.f32 %v2120_v22, %v1940_v1 }
 0xf93   :  { %v2133_v25 = vsel %vm147_vm0, %v2129_v23, 0.0 }
 0xf94   :  { %2134 = vadd.xlane.f32.xlu0 %v2133_v25  ;;  %v2130_v26 = vsel %vm147_vm0, %v2128_v24, 0.0 }
 0xf95   :  { %2131 = vadd.xlane.f32.xlu1 %v2130_v26 }
0x1021   :  { %v2135_v15 = vpop.xlane.xlu0 %2134 }
0x1022   :  { %v2137_v13 = vmul.f32 0.03125, %v2135_v15  ;;  %v2132_v27 = vpop.xlane.xlu1 %2131 }
0x1023   :  { %v2136_v28 = vmul.f32 0.03125, %v2132_v27 }
0x1024   :  { %v2139_v29 = vsub.f32 %v2129_v23, %v2137_v13 }
0x1025   :  { %v2138_v30 = vsub.f32 %v2128_v24, %v2136_v28 }
0x1026   :  { %v2141_v31 = vmul.f32 %v2139_v29, %v2139_v29 }
0x1027   :  { %v2140_v32 = vmul.f32 %v2138_v30, %v2138_v30 }
0x1028   :  { %v2145_v33 = vsel %vm147_vm0, %v2141_v31, 0.0 }
0x1029   :  { %2146 = vadd.xlane.f32.xlu0 %v2145_v33  ;;  %v2142_v34 = vsel %vm147_vm0, %v2140_v32, 0.0 }
0x102a   :  { %2143 = vadd.xlane.f32.xlu1 %v2142_v34 }
0x10b6   :  { %v2147_v35 = vpop.xlane.xlu0 %2146 }
0x10b7   :  { %v2149_v36 = vmul.f32 0.03125, %v2147_v35  ;;  %v2144_v37 = vpop.xlane.xlu1 %2143 }
0x10b8   :  { %v2148_v38 = vmul.f32 0.03125, %v2144_v37 }
0x10b9   :  { %v2151_v39 = vadd.f32 1e-05, %v2149_v36 }
0x10ba   :  { %v2150_v40 = vadd.f32 1e-05, %v2148_v38 }
0x10bb   :  { %2528 = vrsqrt.f32 %v2151_v39 }
0x10bc   :  { %2530 = vrsqrt.f32 %v2150_v40 }
0x10c5   :  { %v2529_v41 = vpop.eup %2528 }
0x10c6   :  { %v2531_v43 = vpop.eup %2530  ;;  %v2155_v7 = vmul.f32 %v2529_v41, %v2139_v29 }
0x10c7   :  { %v2154_v5 = vmul.f32 %v2531_v43, %v2138_v30 }
0x10c8   :  { %v2164_v45 = vmul.f32 %v2240_v42, %v2155_v7 }
0x10c9   :  { %v2163_v46 = vmul.f32 %v2240_v42, %v2154_v5 }
0x10ca   :  { %v2173_v47 = vadd.f32 %v2241_v44, %v2164_v45 }
0x10cb   :  { %v2172_v48 = vadd.f32 %v2241_v44, %v2163_v46 }
0x10cc   :  { %2175 = vst.msk [vmem:[#allocation14 + $0x8] sm:$0xff] %vm147_vm0, %v2173_v47 }
0x10cd   :  { %2174 = vst.msk [vmem:[#allocation14] sm:$0xff] %vm147_vm0, %v2172_v48 }
0x10ce   :  { %2697 = shalt.err (!%p2694_p4)
}
0x10cf   :  { %s2698_s5 = scalar_lea.hbm %s3137_s13, 256 }
0x10d0   :  { %p2699_p5 = scmp.ne.s32.totalorder %s3137_s13, %s2698_s5  ;;  %p2702_p6 = scmp.lt.u32.totalorder %s2698_s5, %s3137_s13 }
0x10d2   :  { %p2704_p7 = pnand %p2702_p6, %p2699_p5 }
0x10d4   :  { %2707 = shalt.err (!%p2704_p7)
}
0x10d5   :  { %2187 = dma.vmem_to_hbm [thread:$0]  %s2182_s29, 256, %s3137_s13, [#allocation4], %s2720_s20, %s2720_s20, %s2721_s21  }
0x10d6   :  { %2716 = dma.done.wait [#allocation4], 256  }
0x10d7   :  { %2717 = vsyncadd [#allocation4], 4294967040 }
0x10d8   :  { %2191 = vsyncpa [#allocation3], 1 }
0x10d9   :  { %2192 = vsyncpa [#allocation6], 1 }
0x10da   :  { %2193 = vsyncpa [#allocation9], 1 }
0x10db   :  { %2194 = vsyncpa [#allocation12], 1 }
0x10dc   :  { %2195 = vsyncpa [#allocation4], 1 }

</bundles_post_ra>
